<compile_context>
chip_gen: v7x
topology: tpu7x:2x2x1
jax: 0.10.0
libtpu: 0.0.40
codegen_flags: <defaults>
</compile_context>

<pallas_src>
import jax
import jax.numpy as jnp
from jax.experimental import pallas as pl
from jax.experimental.pallas import tpu as pltpu

LANE = 128  # TPU vreg lane width (last dim)


def _round_up(n, m):
    return ((n + m - 1) // m) * m


def _cdiv(a, b):
    return -(-a // b)


def _sublane(dtype):
    # min sublane multiple for the second-to-last dim, by element size
    return {4: 8, 2: 16, 1: 32}[jnp.dtype(dtype).itemsize]


def _pad2(a, rows, cols):
    r, c = a.shape
    return jnp.pad(a, ((0, rows - r), (0, cols - c)))


# ---------------------------------------------------------------------------
# Kernels
# ---------------------------------------------------------------------------
def affine_kernel(x_ref, w_ref, b_ref, o_ref):
    """y = x @ W_fused + b_fused on one (TM, D_pad) batch tile.

    x tile arrives in f32 and is cast to the weights' dtype (bf16) in-kernel;
    accumulation and bias add stay in f32; output stored lane-dense in o_ref.dtype."""
    x = x_ref[...].astype(w_ref.dtype)
    o = jnp.dot(x, w_ref[...], preferred_element_type=jnp.float32) + b_ref[...]
    o_ref[...] = o.astype(o_ref.dtype)


def mlp4_kernel(x_ref, w1_ref, b1_ref, w2_ref, b2_ref, w3_ref, b3_ref,
                w4_ref, b4_ref, o_ref):
    """Validation path: the 4 Linear layers fused, layer-by-layer (f32)."""
    cdt = w1_ref.dtype
    h = jnp.dot(x_ref[...].astype(cdt), w1_ref[...],
                preferred_element_type=jnp.float32) + b1_ref[...]
    h = jnp.dot(h.astype(cdt), w2_ref[...],
                preferred_element_type=jnp.float32) + b2_ref[...]
    h = jnp.dot(h.astype(cdt), w3_ref[...],
                preferred_element_type=jnp.float32) + b3_ref[...]
    o = jnp.dot(h.astype(cdt), w4_ref[...],
                preferred_element_type=jnp.float32) + b4_ref[...]
    o_ref[...] = o.astype(o_ref.dtype)


# ---------------------------------------------------------------------------
# Parameter folding (hoisted out of the forward pass; call once at load time)
# ---------------------------------------------------------------------------
def fold_params(params, *, compute_dtype=jnp.bfloat16):
    """The stack has no nonlinearities -> fold the 4 Linears into one affine map.

    Done once, in f32; weights padded lane-dense and cast to the MXU dtype."""
    w1 = params["w1"].astype(jnp.float32)
    w2 = params["w2"].astype(jnp.float32)
    w3 = params["w3"].astype(jnp.float32)
    w4 = params["w4"].astype(jnp.float32)
    b1 = params["b1"].astype(jnp.float32)
    b2 = params["b2"].astype(jnp.float32)
    b3 = params["b3"].astype(jnp.float32)
    b4 = params["b4"].astype(jnp.float32)

    w_f = ((w1 @ w2) @ w3) @ w4                       # (D, C)
    b_f = ((b1 @ w2 + b2) @ w3 + b3) @ w4 + b4        # (1, C)

    D, C = w_f.shape
    D_pad, C_pad = _round_up(D, LANE), _round_up(C, LANE)
    return {
        "w": _pad2(w_f, D_pad, C_pad).astype(compute_dtype),  # (D_pad, C_pad)
        "b": _pad2(b_f, 1, C_pad),                            # (1, C_pad) f32
        "num_class": C,
    }


def _pick_tm(B, tile_m, sublane_mult):
    # at least 2 batch tiles when possible -> v7x megacore shards the grid axis
    tm = min(tile_m, max(sublane_mult, _round_up(_cdiv(B, 2), sublane_mult)))
    return tm


# ---------------------------------------------------------------------------
# Forward wrappers
# ---------------------------------------------------------------------------
def my_mlp_forward(x, folded, *, tile_m=1024, out_dtype=jnp.bfloat16):
    """Production path: single fused affine kernel over streamed batch tiles."""
    B = x.shape[0]
    D = 1
    for d in x.shape[1:]:
        D *= d
    w_f, b_f = folded["w"], folded["b"]
    C = folded["num_class"]
    D_pad, C_pad = w_f.shape

    # reshape is a free view; no batch padding, no wrapper-side cast of x
    x_flat = jnp.reshape(x, (B, D)).astype(jnp.float32)
    if D != D_pad:  # only needed when image_size^2 is not a lane multiple
        x_flat = jnp.pad(x_flat, ((0, 0), (0, D_pad - D)))

    sub = max(_sublane(jnp.float32), _sublane(out_dtype))
    TM = _pick_tm(B, tile_m, sub)
    grid = (pl.cdiv(B, TM),)

    # x / out stream over (possibly partial) batch tiles; weights stay resident
    x_spec = pl.BlockSpec((TM, D_pad), lambda i: (i, 0))
    w_spec = pl.BlockSpec((D_pad, C_pad), lambda i: (0, 0))
    b_spec = pl.BlockSpec((1, C_pad), lambda i: (0, 0))
    out_spec = pl.BlockSpec((TM, C_pad), lambda i: (i, 0))
    out_shape = jax.ShapeDtypeStruct((B, C_pad), out_dtype)

    out_isz = jnp.dtype(out_dtype).itemsize
    w_isz = jnp.dtype(w_f.dtype).itemsize
    vmem_need = (2 * TM * D_pad * 4            # x double buffer (f32)
                 + 2 * TM * C_pad * out_isz    # out double buffer
                 + D_pad * C_pad * w_isz       # resident weights
                 + C_pad * 4)                  # resident bias
    vmem_limit = int(min(max(4 * vmem_need, 4 << 20), 48 << 20))

    cost = pl.CostEstimate(
        flops=2 * B * D_pad * C_pad,
        transcendentals=0,
        bytes_accessed=(B * D_pad * 4 + D_pad * C_pad * w_isz
                        + C_pad * 4 + B * C_pad * out_isz),
    )

    out = pl.pallas_call(
        affine_kernel,
        out_shape=out_shape,
        grid=grid,
        in_specs=[x_spec, w_spec, b_spec],
        out_specs=out_spec,
        compiler_params=pltpu.CompilerParams(
            dimension_semantics=("parallel",),
            vmem_limit_bytes=vmem_limit,
        ),
        cost_estimate=cost,
    )(x_flat, w_f, b_f)

    return out[:, :C].astype(jnp.float32)


def my_mlp_forward_layers(x, params, *, tile_m=1024):
    """Validation path: 4 fused f32 matmuls, layer-by-layer (matches module exactly)."""
    B = x.shape[0]
    D = 1
    for d in x.shape[1:]:
        D *= d
    H = params["w1"].shape[1]
    C = params["w4"].shape[1]
    D_pad = _round_up(D, LANE)
    H_pad = _round_up(H, LANE)
    C_pad = _round_up(C, LANE)

    x_flat = jnp.reshape(x, (B, D)).astype(jnp.float32)
    if D != D_pad:
        x_flat = jnp.pad(x_flat, ((0, 0), (0, D_pad - D)))

    w1 = _pad2(params["w1"].astype(jnp.float32), D_pad, H_pad)
    w2 = _pad2(params["w2"].astype(jnp.float32), H_pad, H_pad)
    w3 = _pad2(params["w3"].astype(jnp.float32), H_pad, H_pad)
    w4 = _pad2(params["w4"].astype(jnp.float32), H_pad, C_pad)
    b1 = _pad2(params["b1"].astype(jnp.float32), 1, H_pad)
    b2 = _pad2(params["b2"].astype(jnp.float32), 1, H_pad)
    b3 = _pad2(params["b3"].astype(jnp.float32), 1, H_pad)
    b4 = _pad2(params["b4"].astype(jnp.float32), 1, C_pad)

    sub = _sublane(jnp.float32)
    TM = _pick_tm(B, tile_m, sub)
    grid = (pl.cdiv(B, TM),)

    x_spec = pl.BlockSpec((TM, D_pad), lambda i: (i, 0))
    out_spec = pl.BlockSpec((TM, C_pad), lambda i: (i, 0))
    const = lambda shape: pl.BlockSpec(shape, lambda i: (0, 0))

    in_specs = [x_spec]
    operands = [x_flat]
    for w, b in ((w1, b1), (w2, b2), (w3, b3), (w4, b4)):
        in_specs += [const(w.shape), const(b.shape)]
        operands += [w, b]

    out = pl.pallas_call(
        mlp4_kernel,
        out_shape=jax.ShapeDtypeStruct((B, C_pad), jnp.float32),
        grid=grid,
        in_specs=in_specs,
        out_specs=out_spec,
        compiler_params=pltpu.CompilerParams(
            dimension_semantics=("parallel",),
            vmem_limit_bytes=32 * 1024 * 1024,
        ),
    )(*operands)

    return out[:, :C]


# ---------------------------------------------------------------------------
# Init + pure-JAX reference (mirrors the PyTorch module exactly)
# ---------------------------------------------------------------------------
def init_params(key, image_size, hidden_size, num_class):
    """torch.nn.Linear-like init (uniform +-1/sqrt(fan_in)); weights stored (in, out)."""
    dims = [
        (image_size * image_size, hidden_size),  # mlp1
        (hidden_size, hidden_size),              # mlp2
        (hidden_size, hidden_size),              # mlp3
        (hidden_size, num_class),                # mlp4
    ]
    params = {}
    for i, (fan_in, fan_out) in enumerate(dims, start=1):
        key, kw, kb = jax.random.split(key, 3)
        bound = 1.0 / jnp.sqrt(fan_in)
        params[f"w{i}"] = jax.random.uniform(
            kw, (fan_in, fan_out), jnp.float32, -bound, bound)
        params[f"b{i}"] = jax.random.uniform(
            kb, (1, fan_out), jnp.float32, -bound, bound)
    return params


def reference_forward(x, params):
    B = x.shape[0]
    h = jnp.reshape(x, (B, -1))
    h = h @ params["w1"] + params["b1"]
    h = h @ params["w2"] + params["b2"]
    h = h @ params["w3"] + params["b3"]
    h = h @ params["w4"] + params["b4"]
    return h


if __name__ == "__main__":
    image_size = 16
    hidden_size = 32
    num_class = 10
    batch = 2

    key = jax.random.PRNGKey(0)
    key, kx = jax.random.split(key)
    x = jax.random.normal(kx, (batch, image_size, image_size), jnp.float32)
    params = init_params(key, image_size, hidden_size, num_class)

    ref = reference_forward(x, params)

    # 1) exact-fidelity validation path: 4 fused matmuls in f32 (layer-by-layer)
    out_exact = my_mlp_forward_layers(x, params)
    out_exact = jax.block_until_ready(out_exact)
    assert out_exact.shape == (batch, num_class)
    assert jnp.allclose(out_exact, ref, atol=1e-4, rtol=1e-4)

    # 2) production fast path: layers folded once at load time, bf16 MXU operands,
    #    lane-dense bf16 output
    folded = fold_params(params, compute_dtype=jnp.bfloat16)
    out_fast = my_mlp_forward(x, folded)
    out_fast = jax.block_until_ready(out_fast)
    assert out_fast.shape == (batch, num_class)
    assert jnp.allclose(out_fast, ref, atol=3e-2, rtol=3e-2)

    print("KERNEL_OK")
</pallas_src>

<mosaic_0001>
module attributes {stable_mosaic.version = 11 : i64} {
  func.func @mlp4_kernel(%arg0: i32, %arg1: memref<8x256xf32, #tpu.memory_space<vmem>>, %arg2: memref<256x128xf32, #tpu.memory_space<vmem>>, %arg3: memref<1x128xf32, #tpu.memory_space<vmem>>, %arg4: memref<128x128xf32, #tpu.memory_space<vmem>>, %arg5: memref<1x128xf32, #tpu.memory_space<vmem>>, %arg6: memref<128x128xf32, #tpu.memory_space<vmem>>, %arg7: memref<1x128xf32, #tpu.memory_space<vmem>>, %arg8: memref<128x128xf32, #tpu.memory_space<vmem>>, %arg9: memref<1x128xf32, #tpu.memory_space<vmem>>, %arg10: memref<8x128xf32, #tpu.memory_space<vmem>>) attributes {dimension_semantics = [#tpu.dimension_semantics<parallel>], iteration_bounds = array<i64: 1>, scalar_prefetch = 0 : i64, scratch_operands = 0 : i64, tpu.core_type = #tpu.core_type<tc>, window_params = [{transform_indices = @transform_0, window_bounds = array<i64: 8, 256>}, {pipeline_mode = #tpu.pipeline_mode<synchronous>, transform_indices = @transform_1, window_bounds = array<i64: 256, 128>}, {pipeline_mode = #tpu.pipeline_mode<synchronous>, transform_indices = @transform_2, window_bounds = array<i64: 1, 128>}, {pipeline_mode = #tpu.pipeline_mode<synchronous>, transform_indices = @transform_3, window_bounds = array<i64: 128, 128>}, {pipeline_mode = #tpu.pipeline_mode<synchronous>, transform_indices = @transform_4, window_bounds = array<i64: 1, 128>}, {pipeline_mode = #tpu.pipeline_mode<synchronous>, transform_indices = @transform_5, window_bounds = array<i64: 128, 128>}, {pipeline_mode = #tpu.pipeline_mode<synchronous>, transform_indices = @transform_6, window_bounds = array<i64: 1, 128>}, {pipeline_mode = #tpu.pipeline_mode<synchronous>, transform_indices = @transform_7, window_bounds = array<i64: 128, 128>}, {pipeline_mode = #tpu.pipeline_mode<synchronous>, transform_indices = @transform_8, window_bounds = array<i64: 1, 128>}, {transform_indices = @transform_9, window_bounds = array<i64: 8, 128>}]} {
    %c0 = arith.constant 0 : index
    %c0_0 = arith.constant 0 : index
    %0 = vector.load %arg1[%c0, %c0_0] : memref<8x256xf32, #tpu.memory_space<vmem>>, vector<8x256xf32>
    %c0_1 = arith.constant 0 : index
    %c0_2 = arith.constant 0 : index
    %1 = vector.load %arg2[%c0_1, %c0_2] : memref<256x128xf32, #tpu.memory_space<vmem>>, vector<256x128xf32>
    %cst = arith.constant dense<0.000000e+00> : vector<8x128xf32>
    %2 = tpu.matmul %0, %1, %cst {dimension_numbers = #tpu.dot_dimension_numbers<[1], [0], [0], [1], [0, 0, 1, 1], [], []>} : vector<8x256xf32>, vector<256x128xf32>, vector<8x128xf32> -> vector<8x128xf32>
    %c0_3 = arith.constant 0 : index
    %c0_4 = arith.constant 0 : index
    %3 = vector.load %arg3[%c0_3, %c0_4] : memref<1x128xf32, #tpu.memory_space<vmem>>, vector<1x128xf32>
    %4 = vector.broadcast %3 : vector<1x128xf32> to vector<8x128xf32>
    %5 = arith.addf %2, %4 : vector<8x128xf32>
    %c0_5 = arith.constant 0 : index
    %c0_6 = arith.constant 0 : index
    %6 = vector.load %arg4[%c0_5, %c0_6] : memref<128x128xf32, #tpu.memory_space<vmem>>, vector<128x128xf32>
    %cst_7 = arith.constant dense<0.000000e+00> : vector<8x128xf32>
    %7 = tpu.matmul %5, %6, %cst_7 {dimension_numbers = #tpu.dot_dimension_numbers<[1], [0], [0], [1], [0, 0, 1, 1], [], []>} : vector<8x128xf32>, vector<128x128xf32>, vector<8x128xf32> -> vector<8x128xf32>
    %c0_8 = arith.constant 0 : index
    %c0_9 = arith.constant 0 : index
    %8 = vector.load %arg5[%c0_8, %c0_9] : memref<1x128xf32, #tpu.memory_space<vmem>>, vector<1x128xf32>
    %9 = vector.broadcast %8 : vector<1x128xf32> to vector<8x128xf32>
    %10 = arith.addf %7, %9 : vector<8x128xf32>
    %c0_10 = arith.constant 0 : index
    %c0_11 = arith.constant 0 : index
    %11 = vector.load %arg6[%c0_10, %c0_11] : memref<128x128xf32, #tpu.memory_space<vmem>>, vector<128x128xf32>
    %cst_12 = arith.constant dense<0.000000e+00> : vector<8x128xf32>
    %12 = tpu.matmul %10, %11, %cst_12 {dimension_numbers = #tpu.dot_dimension_numbers<[1], [0], [0], [1], [0, 0, 1, 1], [], []>} : vector<8x128xf32>, vector<128x128xf32>, vector<8x128xf32> -> vector<8x128xf32>
    %c0_13 = arith.constant 0 : index
    %c0_14 = arith.constant 0 : index
    %13 = vector.load %arg7[%c0_13, %c0_14] : memref<1x128xf32, #tpu.memory_space<vmem>>, vector<1x128xf32>
    %14 = vector.broadcast %13 : vector<1x128xf32> to vector<8x128xf32>
    %15 = arith.addf %12, %14 : vector<8x128xf32>
    %c0_15 = arith.constant 0 : index
    %c0_16 = arith.constant 0 : index
    %16 = vector.load %arg8[%c0_15, %c0_16] : memref<128x128xf32, #tpu.memory_space<vmem>>, vector<128x128xf32>
    %cst_17 = arith.constant dense<0.000000e+00> : vector<8x128xf32>
    %17 = tpu.matmul %15, %16, %cst_17 {dimension_numbers = #tpu.dot_dimension_numbers<[1], [0], [0], [1], [0, 0, 1, 1], [], []>} : vector<8x128xf32>, vector<128x128xf32>, vector<8x128xf32> -> vector<8x128xf32>
    %c0_18 = arith.constant 0 : index
    %c0_19 = arith.constant 0 : index
    %18 = vector.load %arg9[%c0_18, %c0_19] : memref<1x128xf32, #tpu.memory_space<vmem>>, vector<1x128xf32>
    %19 = vector.broadcast %18 : vector<1x128xf32> to vector<8x128xf32>
    %20 = arith.addf %17, %19 : vector<8x128xf32>
    %c0_20 = arith.constant 0 : index
    %c0_21 = arith.constant 0 : index
    %21 = vector.load %arg10[%c0_20, %c0_21] : memref<8x128xf32, #tpu.memory_space<vmem>>, vector<8x128xf32>
    tpu.vector_store %arg10[%c0_20, %c0_21], %20 {strides = array<i32>} : memref<8x128xf32, #tpu.memory_space<vmem>>, vector<8x128xf32>,
    return
  }
  func.func @transform_0(%arg0: i32) -> (i32, i32) {
    %c0_i32 = arith.constant 0 : i32
    %c0_i32_0 = arith.constant 0 : i32
    return %arg0, %c0_i32 : i32, i32
  }
  func.func @transform_1(%arg0: i32) -> (i32, i32) {
    %c0_i32 = arith.constant 0 : i32
    %c0_i32_0 = arith.constant 0 : i32
    %c0_i32_1 = arith.constant 0 : i32
    return %c0_i32, %c0_i32_0 : i32, i32
  }
  func.func @transform_2(%arg0: i32) -> (i32, i32) {
    %c0_i32 = arith.constant 0 : i32
    %c0_i32_0 = arith.constant 0 : i32
    %c0_i32_1 = arith.constant 0 : i32
    return %c0_i32, %c0_i32_0 : i32, i32
  }
  func.func @transform_3(%arg0: i32) -> (i32, i32) {
    %c0_i32 = arith.constant 0 : i32
    %c0_i32_0 = arith.constant 0 : i32
    %c0_i32_1 = arith.constant 0 : i32
    return %c0_i32, %c0_i32_0 : i32, i32
  }
  func.func @transform_4(%arg0: i32) -> (i32, i32) {
    %c0_i32 = arith.constant 0 : i32
    %c0_i32_0 = arith.constant 0 : i32
    %c0_i32_1 = arith.constant 0 : i32
    return %c0_i32, %c0_i32_0 : i32, i32
  }
  func.func @transform_5(%arg0: i32) -> (i32, i32) {
    %c0_i32 = arith.constant 0 : i32
    %c0_i32_0 = arith.constant 0 : i32
    %c0_i32_1 = arith.constant 0 : i32
    return %c0_i32, %c0_i32_0 : i32, i32
  }
  func.func @transform_6(%arg0: i32) -> (i32, i32) {
    %c0_i32 = arith.constant 0 : i32
    %c0_i32_0 = arith.constant 0 : i32
    %c0_i32_1 = arith.constant 0 : i32
    return %c0_i32, %c0_i32_0 : i32, i32
  }
  func.func @transform_7(%arg0: i32) -> (i32, i32) {
    %c0_i32 = arith.constant 0 : i32
    %c0_i32_0 = arith.constant 0 : i32
    %c0_i32_1 = arith.constant 0 : i32
    return %c0_i32, %c0_i32_0 : i32, i32
  }
  func.func @transform_8(%arg0: i32) -> (i32, i32) {
    %c0_i32 = arith.constant 0 : i32
    %c0_i32_0 = arith.constant 0 : i32
    %c0_i32_1 = arith.constant 0 : i32
    return %c0_i32, %c0_i32_0 : i32, i32
  }
  func.func @transform_9(%arg0: i32) -> (i32, i32) {
    %c0_i32 = arith.constant 0 : i32
    %c0_i32_0 = arith.constant 0 : i32
    return %arg0, %c0_i32 : i32, i32
  }
}

</mosaic_0001>

<bundles_post_ra>
// kernel: tpu_custom_call.1
= control target key start
LH: loop header
LB: loop body
LE: loop exit
PB: predicated region body
PF: predicated region fallthrough
CT: control target
= control target key end

     0   :  { %14 = vsyncpa [#allocation3], 0  ;;  %s1192_s0 = inlined_call_operand.hbm [shape: f32[2,256], index: 0, kind: input, shape index: {}]   ;;  %s1193_s1 = inlined_call_operand.hbm [shape: f32[256,128], index: 1, kind: input, shape index: {}]   ;;  %s1194_s2 = inlined_call_operand.vmem [shape: f32[1,128], index: 2, kind: input, shape index: {}]   ;;  %s1195_s3 = inlined_call_operand.hbm [shape: f32[128,128], index: 3, kind: input, shape index: {}]   ;;  %s1196_s4 = inlined_call_operand.vmem [shape: f32[1,128], index: 4, kind: input, shape index: {}]   ;;  %s1197_s5 = inlined_call_operand.hbm [shape: f32[128,128], index: 5, kind: input, shape index: {}]   ;;  %s1198_s6 = inlined_call_operand.vmem [shape: f32[1,128], index: 6, kind: input, shape index: {}]   ;;  %s1199_s7 = inlined_call_operand.hbm [shape: f32[128,128], index: 7, kind: input, shape index: {}]   ;;  %s1200_s8 = inlined_call_operand.vmem [shape: f32[1,128], index: 8, kind: input, shape index: {}]   ;;  %s1201_s9 = inlined_call_operand.hbm [shape: f32[2,128], index: 9, kind: output, shape index: {}]  }
   0x1   :  { %15 = vsyncpa [#allocation6], 0 }
   0x2   :  { %16 = vsyncpa [#allocation9], 0 }
   0x3   :  { %17 = vsyncpa [#allocation4], 0 }
   0x4   :  { %22 = vsyncadd [#allocation3], 192  ;;  %s996_s30 = smov [#allocation5]   ;;  %s856_s13 = scalar_lea.hbm %s1193_s1, 4096 }
   0x5   :  { %s35_s10 = sshll.u32 %s996_s30, 4  ;;  %p857_p0 = scmp.ne.s32.totalorder %s1193_s1, %s856_s13  ;;  %s36_s10 = int_to_ptr.vmem [resolvable:$true] %s35_s10 }
   0x6   :  { %p860_p1 = scmp.lt.u32.totalorder %s856_s13, %s1193_s1 }
   0x8   :  { %p862_p2 = pnand %p860_p1, %p857_p0 }
   0xa   :  { %865 = shalt.err (!%p862_p2)
}
   0xb   :  { %s866_s18 = scalar_lea.vmem %s36_s10, 4096  ;;  %p871_p4 = scmp.lt.s32.totalorder %s36_s10, %s36_s10 }
   0xc   :  { %p867_p3 = scmp.ne.s32.totalorder %s36_s10, %s866_s18  ;;  %p872_p5 = scmp.lt.s32.totalorder %s866_s18, %s866_s18 }
   0xe   :  { %p873_p6 = por %p872_p5, %p871_p4 }
  0x10   :  { %p874_p7 = pnand %p873_p6, %p867_p3 }
  0x12   :  { %877 = shalt.err (!%p874_p7)
}
  0x13   :  { %s997_s19 = smov 128   ;;  %s998_s20 = smov 8  }
  0x14   :  { %41 = dma.hbm_to_vmem [thread:$0]  %s1193_s1, 4096, %s36_s10, [#allocation6], %s997_s19, %s997_s19, %s998_s20  }
  0x15   :  { %s999_s23 = smov [#allocation8]   ;;  %s1000_s25 = smov [#allocation2]  }
  0x16   :  { %s63_s24 = sshll.u32 %s999_s23, 4  ;;  %s23_s26 = sshll.u32 %s1000_s25, 4  ;;  %s64_s24 = int_to_ptr.vmem [resolvable:$true] %s63_s24  ;;  %s24_s26 = int_to_ptr.vmem [resolvable:$true] %s23_s26 }
  0x17   :  { %s878_s29 = scalar_lea.hbm %s1197_s5, 2048 }
  0x18   :  { %p879_p8 = scmp.ne.s32.totalorder %s1197_s5, %s878_s29  ;;  %p882_p9 = scmp.lt.u32.totalorder %s878_s29, %s1197_s5 }
  0x1a   :  { %p884_p10 = pnand %p882_p9, %p879_p8 }
  0x1c   :  { %887 = shalt.err (!%p884_p10)
}
  0x1d   :  { %s888_s1 = scalar_lea.vmem %s64_s24, 2048  ;;  %p893_p12 = scmp.lt.s32.totalorder %s64_s24, %s64_s24 }
  0x1e   :  { %p889_p11 = scmp.ne.s32.totalorder %s64_s24, %s888_s1  ;;  %p894_p13 = scmp.lt.s32.totalorder %s888_s1, %s888_s1 }
  0x20   :  { %p895_p0 = por %p894_p13, %p893_p12 }
  0x22   :  { %p896_p1 = pnand %p895_p0, %p889_p11 }
  0x24   :  { %899 = shalt.err (!%p896_p1)
}
  0x25   :  { %69 = dma.hbm_to_vmem [thread:$0]  %s1197_s5, 2048, %s64_s24, [#allocation9], %s997_s19, %s997_s19, %s998_s20  }
  0x26   :  { %s900_s17 = scalar_lea.hbm %s1192_s0, 64 }
  0x27   :  { %p901_p2 = scmp.ne.s32.totalorder %s1192_s0, %s900_s17  ;;  %p904_p3 = scmp.lt.u32.totalorder %s900_s17, %s1192_s0 }
  0x29   :  { %p906_p4 = pnand %p904_p3, %p901_p2 }
  0x2b   :  { %909 = shalt.err (!%p906_p4)
}
  0x2c   :  { %s910_s25 = scalar_lea.vmem %s24_s26, 64  ;;  %s914_s27 = scalar_lea.vmem %s24_s26, 256 }
  0x2d   :  { %p911_p5 = scmp.ne.s32.totalorder %s24_s26, %s910_s25  ;;  %p915_p6 = scmp.lt.s32.totalorder %s24_s26, %s24_s26 }
  0x2e   :  { %p916_p7 = scmp.lt.s32.totalorder %s914_s27, %s910_s25 }
  0x30   :  { %p917_p8 = por %p916_p7, %p915_p6 }
  0x32   :  { %p918_p9 = pnand %p917_p8, %p911_p5 }
  0x34   :  { %921 = shalt.err (!%p918_p9)
}
  0x35   :  { %s1001_s5 = smov 64   ;;  %s1002_s24 = smov 4  }
  0x36   :  { %29 = dma.hbm_to_vmem [thread:$0]  %s1192_s0, 64, %s24_s26, [#allocation3], %s1001_s5, %s1001_s5, %s1002_s24  }
  0x37   :  { %s1003_s30 = smov [#allocation7]   ;;  %s1004_s12 = smov [#allocation10]  }
  0x38   :  { %s49_s11 = sshll.u32 %s1003_s30, 4  ;;  %s77_s13 = sshll.u32 %s1004_s12, 4  ;;  %s50_s11 = int_to_ptr.vmem [resolvable:$true] %s49_s11  ;;  %s78_s13 = int_to_ptr.vmem [resolvable:$true] %s77_s13 }
  0x39   :  { %s922_s14 = scalar_lea.hbm %s1195_s3, 2048 }
  0x3a   :  { %p923_p10 = scmp.ne.s32.totalorder %s1195_s3, %s922_s14  ;;  %p926_p11 = scmp.lt.u32.totalorder %s922_s14, %s1195_s3 }
  0x3c   :  { %p928_p12 = pnand %p926_p11, %p923_p10 }
  0x3e   :  { %931 = shalt.err (!%p928_p12)
}
  0x3f   :  { %s932_s0 = scalar_lea.vmem %s50_s11, 2048  ;;  %p937_p0 = scmp.lt.s32.totalorder %s50_s11, %s50_s11 }
  0x40   :  { %p933_p13 = scmp.ne.s32.totalorder %s50_s11, %s932_s0  ;;  %p938_p1 = scmp.lt.s32.totalorder %s932_s0, %s932_s0 }
  0x42   :  { %p939_p2 = por %p938_p1, %p937_p0 }
  0x44   :  { %p940_p3 = pnand %p939_p2, %p933_p13 }
  0x46   :  { %943 = shalt.err (!%p940_p3)
}
  0x47   :  { %55 = dma.hbm_to_vmem [thread:$0]  %s1195_s3, 2048, %s50_s11, [#allocation6], %s997_s19, %s997_s19, %s998_s20  }
  0x48   :  { %s944_s25 = scalar_lea.hbm %s1199_s7, 2048 }
  0x49   :  { %p945_p4 = scmp.ne.s32.totalorder %s1199_s7, %s944_s25  ;;  %p948_p5 = scmp.lt.u32.totalorder %s944_s25, %s1199_s7 }
  0x4b   :  { %p950_p6 = pnand %p948_p5, %p945_p4 }
  0x4d   :  { %953 = shalt.err (!%p950_p6)
}
  0x4e   :  { %s954_s29 = scalar_lea.vmem %s78_s13, 2048  ;;  %p959_p8 = scmp.lt.s32.totalorder %s78_s13, %s78_s13 }
  0x4f   :  { %p955_p7 = scmp.ne.s32.totalorder %s78_s13, %s954_s29  ;;  %p960_p9 = scmp.lt.s32.totalorder %s954_s29, %s954_s29 }
  0x51   :  { %p961_p10 = por %p960_p9, %p959_p8 }
  0x53   :  { %p962_p11 = pnand %p961_p10, %p955_p7 }
  0x55   :  { %965 = shalt.err (!%p962_p11)
}
  0x56   :  { %83 = dma.hbm_to_vmem [thread:$0]  %s1199_s7, 2048, %s78_s13, [#allocation9], %s997_s19, %s997_s19, %s998_s20  }
  0x57   :  { %988 = dma.done.wait [#allocation3], 256  }
  0x58   :  { %989 = vsyncadd [#allocation3], 4294967040 }
  0x59   :  { %990 = dma.done.wait [#allocation6], 6144  }
  0x5a   :  { %991 = vsyncadd [#allocation6], 4294961152 }
  0x5b   :  { %992 = dma.done.wait [#allocation9], 4096  }
  0x5c   :  { %993 = vsyncadd [#allocation9], 4294963200  ;;  %v1005_v0 = vmov 0.0|0.0   ;;  %v121_v1 = vld [vmem:[#allocation5 + $0x80] sm:$0xff]  ;;  %v122_v2 = vld [vmem:[#allocation5 + $0x88] sm:$0xff]  ;;  %vm1006_vm0 = vmmov 0  }
  0x5d   :  { %764 = vmatprep.subr.bf16.mxu1 %v1005_v0  ;;  %v105_v3 = vld [vmem:[#allocation5] sm:$0xff]  ;;  %v732_v4 = vpack.c.bf16 %v122_v2, %v121_v1  ;;  %v106_v5 = vld [vmem:[#allocation5 + $0x8] sm:$0xff]  ;;  %v123_v6 = vld [vmem:[#allocation5 + $0x90] sm:$0xff] }
  0x5e   :  { %v124_v7 = vld [vmem:[#allocation5 + $0x98] sm:$0xff]  ;;  %v734_v8 = vpack.c.bf16 %v106_v5, %v105_v3  ;;  %v107_v10 = vld [vmem:[#allocation5 + $0x10] sm:$0xff]  ;;  %v125_v12 = vld [vmem:[#allocation5 + $0xa0] sm:$0xff] }
  0x5f   :  { %v736_v9 = vpack.c.bf16 %v124_v7, %v123_v6  ;;  %v108_v11 = vld [vmem:[#allocation5 + $0x18] sm:$0xff]  ;;  %733 = vmatprep.subr.bf16.mxu0 %v732_v4  ;;  %v126_v13 = vld [vmem:[#allocation5 + $0xa8] sm:$0xff]  ;;  %v109_v16 = vld [vmem:[#allocation5 + $0x20] sm:$0xff] }
  0x60   :  { %735 = vmatpush3.bf16.msra.mxu0 %v734_v8  ;;  %v738_v14 = vpack.c.bf16 %v108_v11, %v107_v10  ;;  %v740_v15 = vpack.c.bf16 %v126_v13, %v125_v12  ;;  %v110_v17 = vld [vmem:[#allocation5 + $0x28] sm:$0xff]  ;;  %v127_v18 = vld [vmem:[#allocation5 + $0xb0] sm:$0xff]  ;;  %v128_v19 = vld [vmem:[#allocation5 + $0xb8] sm:$0xff] }
  0x61   :  { %737 = vmatprep.subr.bf16.mxu0 %v736_v9  ;;  %v742_v20 = vpack.c.bf16 %v110_v17, %v109_v16  ;;  %v744_v21 = vpack.c.bf16 %v128_v19, %v127_v18  ;;  %v111_v22 = vld [vmem:[#allocation5 + $0x30] sm:$0xff]  ;;  %v112_v23 = vld [vmem:[#allocation5 + $0x38] sm:$0xff]  ;;  %v129_v24 = vld [vmem:[#allocation5 + $0xc0] sm:$0xff] }
  0x62   :  { %v130_v25 = vld [vmem:[#allocation5 + $0xc8] sm:$0xff]  ;;  %v113_v26 = vld [vmem:[#allocation5 + $0x40] sm:$0xff]  ;;  %v746_v28 = vpack.c.bf16 %v112_v23, %v111_v22  ;;  %v1134_v29 = vld.sshfl [vmem:[#allocation2] sm:$0xff pattern:$0x76325410] }
  0x63   :  { %v114_v27 = vld [vmem:[#allocation5 + $0x48] sm:$0xff]  ;;  %v1136_v30 = vld.sshfl [vmem:[#allocation2 + $0x8] sm:$0xff pattern:$0x76325410]  ;;  %v238_v31 = vld [vmem:[#allocation7] sm:$0xff]  ;;  %v748_v32 = vpack.c.bf16 %v130_v25, %v129_v24 }
  0x64   :  { %739 = vmatpush3.bf16.msra.mxu0 %v738_v14  ;;  %v239_v33 = vld [vmem:[#allocation7 + $0x8] sm:$0xff]  ;;  %v240_v34 = vld [vmem:[#allocation7 + $0x10] sm:$0xff]  ;;  %v241_v35 = vld [vmem:[#allocation7 + $0x18] sm:$0xff]  ;;  %v750_v39 = vpack.c.bf16 %v114_v27, %v113_v26  ;;  %v165_v41 = vcombine.high %v1134_v29, %v1136_v30  ;;  %v164_v6 = vcombine.low %v1134_v29, %v1136_v30  ;;  %v1007_v14 = vmov 0.0  }
  0x65   :  { %741 = vmatprep.subr.bf16.mxu0 %v740_v15  ;;  %v131_v36 = vld [vmem:[#allocation5 + $0xd0] sm:$0xff]  ;;  %v132_v37 = vld [vmem:[#allocation5 + $0xd8] sm:$0xff]  ;;  %v765_v38 = vpack.c.bf16 %v239_v33, %v238_v31  ;;  %v768_v42 = vpack.c.bf16 %v241_v35, %v240_v34  ;;  %v242_v45 = vld [vmem:[#allocation7 + $0x20] sm:$0xff]  ;;  %659 = vmatprep.mubr.msk.f32.mxu1 %vm1006_vm0, %v1007_v14 }
  0x66   :  { %v115_v40 = vld [vmem:[#allocation5 + $0x50] sm:$0xff]  ;;  %v752_v43 = vpack.c.bf16 %v132_v37, %v131_v36  ;;  %v116_v44 = vld [vmem:[#allocation5 + $0x58] sm:$0xff]  ;;  %v243_v46 = vld [vmem:[#allocation7 + $0x28] sm:$0xff]  ;;  %232 = vmatprep.mubr.f32.mxu0 %v165_v41 }
  0x67   :  { %766 = vmatpush3.bf16.msra.mxu1 %v765_v38  ;;  %v133_v47 = vld [vmem:[#allocation5 + $0xe0] sm:$0xff]  ;;  %v134_v48 = vld [vmem:[#allocation5 + $0xe8] sm:$0xff]  ;;  %v754_v49 = vpack.c.bf16 %v116_v44, %v115_v40  ;;  %v771_v51 = vpack.c.bf16 %v243_v46, %v242_v45  ;;  %v244_v54 = vld [vmem:[#allocation7 + $0x30] sm:$0xff] }
  0x68   :  { %743 = vmatpush3.bf16.msra.mxu0 %v742_v20  ;;  %767 = vmatprep.subr.bf16.mxu1 %v1005_v0  ;;  %v117_v50 = vld [vmem:[#allocation5 + $0x60] sm:$0xff]  ;;  %v756_v52 = vpack.c.bf16 %v134_v48, %v133_v47  ;;  %v118_v53 = vld [vmem:[#allocation5 + $0x68] sm:$0xff]  ;;  %v245_v55 = vld [vmem:[#allocation7 + $0x38] sm:$0xff] }
  0x69   :  { %745 = vmatprep.subr.bf16.mxu0 %v744_v21  ;;  %v135_v56 = vld [vmem:[#allocation5 + $0xf0] sm:$0xff]  ;;  %v136_v57 = vld [vmem:[#allocation5 + $0xf8] sm:$0xff]  ;;  %v758_v58 = vpack.c.bf16 %v118_v53, %v117_v50  ;;  %v774_v60 = vpack.c.bf16 %v245_v55, %v244_v54  ;;  %v246_v63 = vld [vmem:[#allocation7 + $0x40] sm:$0xff] }
  0x6a   :  { %v119_v59 = vld [vmem:[#allocation5 + $0x70] sm:$0xff]  ;;  %v760_v61 = vpack.c.bf16 %v136_v57, %v135_v56  ;;  %v120_v62 = vld [vmem:[#allocation5 + $0x78] sm:$0xff]  ;;  %v247_v1 = vld [vmem:[#allocation7 + $0x48] sm:$0xff] }
  0x6b   :  { %769 = vmatpush3.bf16.msra.mxu1 %v768_v42  ;;  %v762_v2 = vpack.c.bf16 %v120_v62, %v119_v59  ;;  %v777_v3 = vpack.c.bf16 %v247_v1, %v246_v63  ;;  %v248_v4 = vld [vmem:[#allocation7 + $0x50] sm:$0xff]  ;;  %v249_v5 = vld [vmem:[#allocation7 + $0x58] sm:$0xff]  ;;  %v250_v8 = vld [vmem:[#allocation7 + $0x60] sm:$0xff] }
  0x6c   :  { %747 = vmatpush3.bf16.msra.mxu0 %v746_v28  ;;  %770 = vmatprep.subr.bf16.mxu1 %v1005_v0  ;;  %v780_v7 = vpack.c.bf16 %v249_v5, %v248_v4  ;;  %v251_v9 = vld [vmem:[#allocation7 + $0x68] sm:$0xff]  ;;  %v252_v11 = vld [vmem:[#allocation7 + $0x70] sm:$0xff]  ;;  %v253_v12 = vld [vmem:[#allocation7 + $0x78] sm:$0xff] }
  0x6d   :  { %749 = vmatprep.subr.bf16.mxu0 %v748_v32  ;;  %v783_v10 = vpack.c.bf16 %v251_v9, %v250_v8  ;;  %v786_v13 = vpack.c.bf16 %v253_v12, %v252_v11  ;;  %v331_v15 = vld [vmem:[#allocation8] sm:$0xff]  ;;  %v332_v16 = vld [vmem:[#allocation8 + $0x8] sm:$0xff]  ;;  %v333_v17 = vld [vmem:[#allocation8 + $0x10] sm:$0xff] }
  0x6e   :  { %v789_v18 = vpack.c.bf16 %v332_v16, %v331_v15  ;;  %v334_v19 = vld [vmem:[#allocation8 + $0x18] sm:$0xff]  ;;  %v335_v21 = vld [vmem:[#allocation8 + $0x20] sm:$0xff]  ;;  %v336_v22 = vld [vmem:[#allocation8 + $0x28] sm:$0xff] }
  0x6f   :  { %772 = vmatpush3.bf16.msra.mxu1 %v771_v51  ;;  %v792_v20 = vpack.c.bf16 %v334_v19, %v333_v17  ;;  %v795_v23 = vpack.c.bf16 %v336_v22, %v335_v21  ;;  %v337_v24 = vld [vmem:[#allocation8 + $0x30] sm:$0xff]  ;;  %v338_v25 = vld [vmem:[#allocation8 + $0x38] sm:$0xff]  ;;  %v339_v27 = vld [vmem:[#allocation8 + $0x40] sm:$0xff] }
  0x70   :  { %751 = vmatpush3.bf16.msra.mxu0 %v750_v39  ;;  %773 = vmatprep.subr.bf16.mxu1 %v1005_v0  ;;  %v798_v26 = vpack.c.bf16 %v338_v25, %v337_v24  ;;  %v340_v28 = vld [vmem:[#allocation8 + $0x48] sm:$0xff]  ;;  %v341_v30 = vld [vmem:[#allocation8 + $0x50] sm:$0xff]  ;;  %v342_v31 = vld [vmem:[#allocation8 + $0x58] sm:$0xff] }
  0x71   :  { %753 = vmatprep.subr.bf16.mxu0 %v752_v43  ;;  %v801_v29 = vpack.c.bf16 %v340_v28, %v339_v27  ;;  %v804_v32 = vpack.c.bf16 %v342_v31, %v341_v30  ;;  %v343_v33 = vld [vmem:[#allocation8 + $0x60] sm:$0xff]  ;;  %v344_v34 = vld [vmem:[#allocation8 + $0x68] sm:$0xff]  ;;  %v537_v37 = vld [vmem:[%s1194_s2] ss:$0 sm:$0xff] }
  0x72   :  { %v807_v35 = vpack.c.bf16 %v344_v34, %v343_v33  ;;  %v345_v41 = vld [vmem:[#allocation8 + $0x70] sm:$0xff]  ;;  %v346_v42 = vld [vmem:[#allocation8 + $0x78] sm:$0xff]  ;;  %v424_v44 = vld [vmem:[#allocation10] sm:$0xff] }
  0x73   :  { %775 = vmatpush3.bf16.msra.mxu1 %v774_v60  ;;  %v810_v43 = vpack.c.bf16 %v346_v42, %v345_v41  ;;  %v425_v45 = vld [vmem:[#allocation10 + $0x8] sm:$0xff]  ;;  %v426_v46 = vld [vmem:[#allocation10 + $0x10] sm:$0xff]  ;;  %v427_v48 = vld [vmem:[#allocation10 + $0x18] sm:$0xff] }
  0x74   :  { %755 = vmatpush3.bf16.msra.mxu0 %v754_v49  ;;  %776 = vmatprep.subr.bf16.mxu1 %v1005_v0  ;;  %v813_v47 = vpack.c.bf16 %v425_v45, %v424_v44  ;;  %v816_v49 = vpack.c.bf16 %v427_v48, %v426_v46  ;;  %v428_v50 = vld [vmem:[#allocation10 + $0x20] sm:$0xff]  ;;  %v429_v51 = vld [vmem:[#allocation10 + $0x28] sm:$0xff]  ;;  %v430_v53 = vld [vmem:[#allocation10 + $0x30] sm:$0xff] }
  0x75   :  { %757 = vmatprep.subr.bf16.mxu0 %v756_v52  ;;  %v819_v52 = vpack.c.bf16 %v429_v51, %v428_v50  ;;  %v431_v54 = vld [vmem:[#allocation10 + $0x38] sm:$0xff]  ;;  %v432_v56 = vld [vmem:[#allocation10 + $0x40] sm:$0xff]  ;;  %v433_v57 = vld [vmem:[#allocation10 + $0x48] sm:$0xff] }
  0x76   :  { %v822_v55 = vpack.c.bf16 %v431_v54, %v430_v53  ;;  %v434_v59 = vld [vmem:[#allocation10 + $0x50] sm:$0xff]  ;;  %v435_v60 = vld [vmem:[#allocation10 + $0x58] sm:$0xff]  ;;  %v436_v62 = vld [vmem:[#allocation10 + $0x60] sm:$0xff] }
  0x77   :  { %778 = vmatpush3.bf16.msra.mxu1 %v777_v3  ;;  %v437_v63 = vld [vmem:[#allocation10 + $0x68] sm:$0xff]  ;;  %v539_v9 = vld [vmem:[%s1198_s6] ss:$0 sm:$0xff] }
  0x78   :  { %759 = vmatpush3.bf16.msra.mxu0 %v758_v58  ;;  %779 = vmatprep.subr.bf16.mxu1 %v1005_v0  ;;  %v825_v58 = vpack.c.bf16 %v433_v57, %v432_v56  ;;  %v831_v1 = vpack.c.bf16 %v437_v63, %v436_v62 }
  0x79   :  { %761 = vmatprep.subr.bf16.mxu0 %v760_v61  ;;  %v828_v61 = vpack.c.bf16 %v435_v60, %v434_v59 }
  0x7b   :  { %781 = vmatpush3.bf16.msra.mxu1 %v780_v7  ;;  %v439_v7 = vld [vmem:[#allocation10 + $0x78] sm:$0xff] }
  0x7c   :  { %763 = vmatpush3.bf16.msra.mxu0 %v762_v2  ;;  %782 = vmatprep.subr.bf16.mxu1 %v1005_v0  ;;  %v538_v2 = vld [vmem:[%s1196_s4] ss:$0 sm:$0xff] }
  0x7d   :  { %788 = vmatprep.subr.bf16.mxu0 %v1005_v0 }
  0x7f   :  { %233 = vmatmul.mubr.f32.vlgmr.msra.gmra.mrb[0].mxu0 %v164_v6  ;;  %784 = vmatpush3.bf16.msra.mxu1 %v783_v10  ;;  %v438_v6 = vld [vmem:[#allocation10 + $0x70] sm:$0xff] }
  0x80   :  { %785 = vmatprep.subr.bf16.mxu1 %v1005_v0  ;;  %694 = vmatprep.mubr.msk.f32.mxu0 %vm1006_vm0, %v1007_v14  ;;  %v834_v8 = vpack.c.bf16 %v439_v7, %v438_v6 }
  0x81   :  { %790 = vmatpush3.bf16.msra.mxu0 %v789_v18 }
  0x82   :  { %791 = vmatprep.subr.bf16.mxu0 %v1005_v0 }
  0x83   :  { %787 = vmatpush3.bf16.msra.mxu1 %v786_v13 }
  0x84   :  { %812 = vmatprep.subr.bf16.mxu1 %v1005_v0 }
  0x85   :  { %793 = vmatpush3.bf16.msra.mxu0 %v792_v20 }
  0x86   :  { %794 = vmatprep.subr.bf16.mxu0 %v1005_v0 }
  0x89   :  { %796 = vmatpush3.bf16.msra.mxu0 %v795_v23 }
  0x8a   :  { %797 = vmatprep.subr.bf16.mxu0 %v1005_v0 }
  0x8d   :  { %799 = vmatpush3.bf16.msra.mxu0 %v798_v26 }
  0x8e   :  { %800 = vmatprep.subr.bf16.mxu0 %v1005_v0 }
  0x91   :  { %802 = vmatpush3.bf16.msra.mxu0 %v801_v29 }
  0x92   :  { %803 = vmatprep.subr.bf16.mxu0 %v1005_v0 }
  0x95   :  { %805 = vmatpush3.bf16.msra.mxu0 %v804_v32 }
  0x96   :  { %806 = vmatprep.subr.bf16.mxu0 %v1005_v0 }
  0x99   :  { %808 = vmatpush3.bf16.msra.mxu0 %v807_v35 }
  0x9a   :  { %809 = vmatprep.subr.bf16.mxu0 %v1005_v0 }
  0x9d   :  { %811 = vmatpush3.bf16.msra.mxu0 %v810_v43 }
 0x152   :  { %v573_v36 = vpop.f32.mrb[0].mxu0 }
 0x153   :  { %v574_v38 = vpop.f32.mrb[1].mxu0 }
 0x154   :  { %v575_v39 = vadd.f32 %v574_v38, %v573_v36 }
 0x156   :  { %v235_v40 = vadd.f32 %v575_v39, %v537_v37 }
 0x158   :  { %660 = vmatmul.mubr.f32.vlgmr.msra.gmra.mrb[0].mxu1 %v235_v40 }
 0x159   :  { %729 = vmatprep.mubr.msk.f32.mxu1 %vm1006_vm0, %v1007_v14  ;;  %814 = vmatpush3.bf16.msra.mxu1 %v813_v47 }
 0x15a   :  { %815 = vmatprep.subr.bf16.mxu1 %v1005_v0 }
 0x15d   :  { %817 = vmatpush3.bf16.msra.mxu1 %v816_v49 }
 0x15e   :  { %818 = vmatprep.subr.bf16.mxu1 %v1005_v0 }
 0x161   :  { %820 = vmatpush3.bf16.msra.mxu1 %v819_v52 }
 0x162   :  { %821 = vmatprep.subr.bf16.mxu1 %v1005_v0 }
 0x165   :  { %823 = vmatpush3.bf16.msra.mxu1 %v822_v55 }
 0x166   :  { %824 = vmatprep.subr.bf16.mxu1 %v1005_v0 }
 0x169   :  { %826 = vmatpush3.bf16.msra.mxu1 %v825_v58 }
 0x16a   :  { %827 = vmatprep.subr.bf16.mxu1 %v1005_v0 }
 0x16d   :  { %829 = vmatpush3.bf16.msra.mxu1 %v828_v61 }
 0x16e   :  { %830 = vmatprep.subr.bf16.mxu1 %v1005_v0 }
 0x171   :  { %832 = vmatpush3.bf16.msra.mxu1 %v831_v1 }
 0x172   :  { %833 = vmatprep.subr.bf16.mxu1 %v1005_v0  ;;  %v540_v0 = vld [vmem:[%s1200_s8] ss:$0 sm:$0xff] }
 0x175   :  { %835 = vmatpush3.bf16.msra.mxu1 %v834_v8 }
 0x22b   :  { %v327_v3 = vpop.f32.mrb[0].mxu1 }
 0x22c   :  { %v328_v4 = vadd.f32 %v538_v2, %v327_v3  ;;  %v661_v5 = vpop.f32.mrb[1].mxu1 }
 0x22e   :  { %695 = vmatmul.mubr.f32.vlgmr.msra.gmra.mrb[2].mxu0 %v328_v4 }
 0x301   :  { %v420_v10 = vpop.f32.mrb[2].mxu0 }
 0x302   :  { %v421_v11 = vadd.f32 %v539_v9, %v420_v10  ;;  %v696_v12 = vpop.f32.mrb[3].mxu0 }
 0x304   :  { %730 = vmatmul.mubr.f32.vlgmr.msra.gmra.mrb[2].mxu1 %v421_v11 }
 0x3d7   :  { %v513_v13 = vpop.f32.mrb[2].mxu1 }
 0x3d8   :  { %v514_v14 = vadd.f32 %v540_v0, %v513_v13  ;;  %v731_v15 = vpop.f32.mrb[3].mxu1 }
 0x3da   :  { %517 = vst [vmem:[#allocation11] sm:$0xff] %v514_v14 }
 0x3db   :  { %522 = vsyncadd [#allocation4], 96  ;;  %s1008_s4 = smov [#allocation11]  }
 0x3dc   :  { %s523_s10 = sshll.u32 %s1008_s4, 4  ;;  %s524_s10 = int_to_ptr.vmem [resolvable:$true] %s523_s10 }
 0x3dd   :  { %s966_s14 = scalar_lea.vmem %s524_s10, 32  ;;  %s970_s15 = scalar_lea.vmem %s524_s10, 128 }
 0x3de   :  { %p967_p12 = scmp.ne.s32.totalorder %s524_s10, %s966_s14  ;;  %p971_p13 = scmp.lt.s32.totalorder %s524_s10, %s524_s10 }
 0x3df   :  { %p972_p0 = scmp.lt.s32.totalorder %s970_s15, %s966_s14 }
 0x3e1   :  { %p973_p1 = por %p972_p0, %p971_p13 }
 0x3e3   :  { %p974_p2 = pnand %p973_p1, %p967_p12 }
 0x3e5   :  { %977 = shalt.err (!%p974_p2)
}
 0x3e6   :  { %s978_s8 = scalar_lea.hbm %s1201_s9, 32 }
 0x3e7   :  { %p979_p3 = scmp.ne.s32.totalorder %s1201_s9, %s978_s8  ;;  %p982_p4 = scmp.lt.u32.totalorder %s978_s8, %s1201_s9 }
 0x3e9   :  { %p984_p5 = pnand %p982_p4, %p979_p3 }
 0x3eb   :  { %987 = shalt.err (!%p984_p5)
}
 0x3ec   :  { %s1009_s21 = smov 32   ;;  %s1010_s22 = smov 2  }
 0x3ed   :  { %529 = dma.vmem_to_hbm [thread:$0]  %s524_s10, 32, %s1201_s9, [#allocation4], %s1009_s21, %s1009_s21, %s1010_s22  }
 0x3ee   :  { %994 = dma.done.wait [#allocation4], 128  }
 0x3ef   :  { %995 = vsyncadd [#allocation4], 4294967168 }
 0x3f0   :  { %533 = vsyncpa [#allocation3], 1 }
 0x3f1   :  { %534 = vsyncpa [#allocation6], 1 }
 0x3f2   :  { %535 = vsyncpa [#allocation9], 1 }
 0x3f3   :  { %536 = vsyncpa [#allocation4], 1 }

</bundles_post_ra>
